<compile_context>
chip_gen: v7x
topology: tpu7x:2x2x1
jax: 0.10.0
libtpu: 0.0.40
codegen_flags: <defaults>
</compile_context>

<pallas_src>
import functools

import jax
import jax.numpy as jnp
from jax import lax
from jax.experimental import pallas as pl
from jax.experimental.pallas import tpu as pltpu


def _diffusion_block_kernel(x_ref, w_ref, b_ref, o_ref, acc_ref):
    """Computes one (tm, tn) output tile, accumulating over the K grid axis.

    x_ref:   (tm, tk)  activation tile
    w_ref:   (tn, tk)  weight tile, PyTorch (out, in) layout
    b_ref:   (1, tn)   bias tile
    o_ref:   (tm, tn)  output tile
    acc_ref: (tm, tn)  f32 accumulator scratch (persists across K axis)
    """
    k = pl.program_id(2)

    @pl.when(k == 0)
    def _():
        acc_ref[...] = jnp.zeros_like(acc_ref)

    # x @ W^T with no in-kernel transpose: contract last dim of x against last
    # dim of w (MXU matmul, f32 accumulate).
    acc_ref[...] += lax.dot_general(
        x_ref[...],
        w_ref[...],
        dimension_numbers=(((1,), (1,)), ((), ())),
        preferred_element_type=jnp.float32,
    )

    @pl.when(k == pl.num_programs(2) - 1)
    def _():
        y = acc_ref[...] + b_ref[...]                          # bias (VPU)
        o_ref[...] = jnp.maximum(y, 0.0).astype(o_ref.dtype)   # ReLU


def _pick_tile(dim, target):
    """Largest 128-multiple divisor of `dim` that is <= target, else full dim."""
    if dim <= target:
        return dim
    for cand in (target, 1024, 512, 256, 128):
        if cand <= target and dim % cand == 0:
            return cand
    return dim  # no nice divisor -> take the whole (untiled) dimension


@functools.partial(jax.jit, static_argnames=("block_m", "block_n", "block_k"))
def diffusion_block(x, weight, bias, *, block_m=256, block_n=512, block_k=512):
    """relu(x @ weight.T + bias).

    x: (B, K) f32, weight: (N, K) f32 in PyTorch (out_features, in_features)
    layout, bias: (N,) f32.  For DiffusionBlock, N == K == nunits.
    """
    B, K = x.shape
    N = weight.shape[0]
    assert weight.shape == (N, K)
    assert bias.shape == (N,)

    # ---- tile selection ----------------------------------------------------
    tm = min(block_m, B)
    tn = _pick_tile(N, block_n)
    tk = _pick_tile(K, block_k)

    # Pad the batch up to a multiple of tm; padded rows are computed & dropped.
    Bp = pl.cdiv(B, tm) * tm
    if Bp != B:
        x = jnp.pad(x, ((0, Bp - B), (0, 0)))

    bias2d = bias.reshape(1, N)
    grid = (Bp // tm, N // tn, K // tk)

    cost = pl.CostEstimate(
        flops=2 * B * N * K,
        transcendentals=0,
        bytes_accessed=4 * (B * (N + K) + N * K + N),
    )

    out = pl.pallas_call(
        _diffusion_block_kernel,
        out_shape=jax.ShapeDtypeStruct((Bp, N), x.dtype),
        grid_spec=pltpu.PrefetchScalarGridSpec(
            num_scalar_prefetch=0,
            grid=grid,
            in_specs=[
                pl.BlockSpec((tm, tk), lambda i, j, k: (i, k)),   # x tile
                pl.BlockSpec((tn, tk), lambda i, j, k: (j, k)),   # weight (out,in)
                pl.BlockSpec((1, tn), lambda i, j, k: (0, j)),    # bias tile
            ],
            out_specs=pl.BlockSpec((tm, tn), lambda i, j, k: (i, j)),
            scratch_shapes=[pltpu.VMEM((tm, tn), jnp.float32)],
        ),
        compiler_params=pltpu.CompilerParams(
            dimension_semantics=("parallel", "parallel", "arbitrary"),
            vmem_limit_bytes=64 * 1024 * 1024,
        ),
        cost_estimate=cost,
    )(x, weight, bias2d)

    return out[:B] if Bp != B else out


def _reference(x, weight, bias):
    return jnp.maximum(x @ weight.T + bias, 0.0)


if __name__ == "__main__":
    key = jax.random.PRNGKey(0)

    # --- small, deterministic example consistent with DiffusionBlock(nunits) ---
    B, NUNITS = 8, 128
    kx, kw, kb = jax.random.split(key, 3)
    bound = 1.0 / jnp.sqrt(jnp.float32(NUNITS))  # PyTorch nn.Linear init range
    x = jax.random.normal(kx, (B, NUNITS), dtype=jnp.float32)
    weight = jax.random.uniform(kw, (NUNITS, NUNITS), jnp.float32, -bound, bound)
    bias = jax.random.uniform(kb, (NUNITS,), jnp.float32, -bound, bound)

    out = jax.block_until_ready(diffusion_block(x, weight, bias))
    ref = _reference(x, weight, bias)
    assert out.shape == (B, NUNITS)
    assert jnp.allclose(out, ref, atol=1e-5, rtol=1e-5), "mismatch vs reference"

    # --- second check: exercise the tiled / padded / K-accumulator path -------
    B2, N2 = 50, 256
    kx2, kw2, kb2 = jax.random.split(jax.random.PRNGKey(1), 3)
    bound2 = 1.0 / jnp.sqrt(jnp.float32(N2))
    x2 = jax.random.normal(kx2, (B2, N2), dtype=jnp.float32)
    w2 = jax.random.uniform(kw2, (N2, N2), jnp.float32, -bound2, bound2)
    b2 = jax.random.uniform(kb2, (N2,), jnp.float32, -bound2, bound2)

    out2 = jax.block_until_ready(
        diffusion_block(x2, w2, b2, block_m=16, block_n=128, block_k=128)
    )
    ref2 = _reference(x2, w2, b2)
    assert out2.shape == (B2, N2)
    assert jnp.allclose(out2, ref2, atol=1e-5, rtol=1e-5), "mismatch (tiled path)"

    print("KERNEL_OK")
</pallas_src>

<mosaic_0001>
module attributes {stable_mosaic.version = 11 : i64} {
  func.func @_diffusion_block_kernel(%arg0: i32, %arg1: i32, %arg2: i32, %arg3: memref<8x128xf32, #tpu.memory_space<vmem>>, %arg4: memref<128x128xf32, #tpu.memory_space<vmem>>, %arg5: memref<1x128xf32, #tpu.memory_space<vmem>>, %arg6: memref<8x128xf32, #tpu.memory_space<vmem>>, %arg7: memref<8x128xf32, #tpu.memory_space<vmem>>) attributes {dimension_semantics = [#tpu.dimension_semantics<parallel>, #tpu.dimension_semantics<parallel>, #tpu.dimension_semantics<arbitrary>], iteration_bounds = array<i64: 1, 1, 1>, scalar_prefetch = 0 : i64, scratch_operands = 1 : i64, tpu.core_type = #tpu.core_type<tc>, window_params = [{transform_indices = @transform_0, window_bounds = array<i64: 8, 128>}, {transform_indices = @transform_1, window_bounds = array<i64: 128, 128>}, {transform_indices = @transform_2, window_bounds = array<i64: 1, 128>}, {transform_indices = @transform_3, window_bounds = array<i64: 8, 128>}]} {
    %c0_i32 = arith.constant 0 : i32
    %0 = arith.cmpi eq, %arg2, %c0_i32 : i32
    %1 = arith.extui %0 : i1 to i32
    %c0_i32_0 = arith.constant 0 : i32
    %2 = arith.cmpi ne, %1, %c0_i32_0 : i32
    scf.if %2 {
      %cst_10 = arith.constant 0.000000e+00 : f32
      %12 = vector.broadcast %cst_10 : f32 to vector<8x128xf32>
      %c0_11 = arith.constant 0 : index
      %c0_12 = arith.constant 0 : index
      %13 = vector.load %arg7[%c0_11, %c0_12] : memref<8x128xf32, #tpu.memory_space<vmem>>, vector<8x128xf32>
      tpu.vector_store %arg7[%c0_11, %c0_12], %12 {strides = array<i32>} : memref<8x128xf32, #tpu.memory_space<vmem>>, vector<8x128xf32>,
    } else {
    }
    %c0 = arith.constant 0 : index
    %c0_1 = arith.constant 0 : index
    %3 = vector.load %arg7[%c0, %c0_1] : memref<8x128xf32, #tpu.memory_space<vmem>>, vector<8x128xf32>
    %c0_2 = arith.constant 0 : index
    %c0_3 = arith.constant 0 : index
    %4 = vector.load %arg3[%c0_2, %c0_3] : memref<8x128xf32, #tpu.memory_space<vmem>>, vector<8x128xf32>
    %c0_4 = arith.constant 0 : index
    %c0_5 = arith.constant 0 : index
    %5 = vector.load %arg4[%c0_4, %c0_5] : memref<128x128xf32, #tpu.memory_space<vmem>>, vector<128x128xf32>
    %cst = arith.constant dense<0.000000e+00> : vector<8x128xf32>
    %6 = tpu.matmul %4, %5, %cst {dimension_numbers = #tpu.dot_dimension_numbers<[1], [1], [0], [0], [0, 0, 1, 0], [], []>} : vector<8x128xf32>, vector<128x128xf32>, vector<8x128xf32> -> vector<8x128xf32>
    %7 = arith.addf %3, %6 : vector<8x128xf32>
    %c0_6 = arith.constant 0 : index
    %c0_7 = arith.constant 0 : index
    %8 = vector.load %arg7[%c0_6, %c0_7] : memref<8x128xf32, #tpu.memory_space<vmem>>, vector<8x128xf32>
    tpu.vector_store %arg7[%c0_6, %c0_7], %7 {strides = array<i32>} : memref<8x128xf32, #tpu.memory_space<vmem>>, vector<8x128xf32>,
    %c0_i32_8 = arith.constant 0 : i32
    %9 = arith.cmpi eq, %arg2, %c0_i32_8 : i32
    %10 = arith.extui %9 : i1 to i32
    %c0_i32_9 = arith.constant 0 : i32
    %11 = arith.cmpi ne, %10, %c0_i32_9 : i32
    scf.if %11 {
      %c0_10 = arith.constant 0 : index
      %c0_11 = arith.constant 0 : index
      %12 = vector.load %arg7[%c0_10, %c0_11] : memref<8x128xf32, #tpu.memory_space<vmem>>, vector<8x128xf32>
      %c0_12 = arith.constant 0 : index
      %c0_13 = arith.constant 0 : index
      %13 = vector.load %arg5[%c0_12, %c0_13] : memref<1x128xf32, #tpu.memory_space<vmem>>, vector<1x128xf32>
      %14 = vector.broadcast %13 : vector<1x128xf32> to vector<8x128xf32>
      %15 = arith.addf %12, %14 : vector<8x128xf32>
      %cst_14 = arith.constant 0.000000e+00 : f32
      %16 = vector.broadcast %cst_14 : f32 to vector<8x128xf32>
      %17 = arith.maximumf %15, %16 : vector<8x128xf32>
      %c0_15 = arith.constant 0 : index
      %c0_16 = arith.constant 0 : index
      %18 = vector.load %arg6[%c0_15, %c0_16] : memref<8x128xf32, #tpu.memory_space<vmem>>, vector<8x128xf32>
      tpu.vector_store %arg6[%c0_15, %c0_16], %17 {strides = array<i32>} : memref<8x128xf32, #tpu.memory_space<vmem>>, vector<8x128xf32>,
    } else {
    }
    return
  }
  func.func @transform_0(%arg0: i32, %arg1: i32, %arg2: i32) -> (i32, i32) {
    %c0_i32 = arith.constant 0 : i32
    return %arg0, %arg2 : i32, i32
  }
  func.func @transform_1(%arg0: i32, %arg1: i32, %arg2: i32) -> (i32, i32) {
    %c0_i32 = arith.constant 0 : i32
    return %arg1, %arg2 : i32, i32
  }
  func.func @transform_2(%arg0: i32, %arg1: i32, %arg2: i32) -> (i32, i32) {
    %c0_i32 = arith.constant 0 : i32
    %c0_i32_0 = arith.constant 0 : i32
    return %c0_i32, %arg1 : i32, i32
  }
  func.func @transform_3(%arg0: i32, %arg1: i32, %arg2: i32) -> (i32, i32) {
    %c0_i32 = arith.constant 0 : i32
    return %arg0, %arg1 : i32, i32
  }
}

</mosaic_0001>

<bundles_post_ra>
// kernel: diffusion_block.1
= control target key start
LH: loop header
LB: loop body
LE: loop exit
PB: predicated region body
PF: predicated region fallthrough
CT: control target
= control target key end

     0   :  { %8 = vsyncpa [#allocation4], 0  ;;  %s434_s0 = inlined_call_operand.hbm [shape: f32[8,128], index: 0, kind: input, shape index: {}]   ;;  %s435_s1 = inlined_call_operand.hbm [shape: f32[128,128], index: 1, kind: input, shape index: {}]   ;;  %s436_s2 = inlined_call_operand.hbm [shape: f32[1,128], index: 2, kind: input, shape index: {}]   ;;  %s437_s3 = inlined_call_operand.hbm [shape: f32[8,128], index: 3, kind: output, shape index: {}]  }
   0x1   :  { %9 = vsyncpa [#allocation7], 0 }
   0x2   :  { %10 = vsyncpa [#allocation5], 0  ;;  %s357_s12 = smov [#allocation6]   ;;  %s263_s16 = scalar_lea.hbm %s435_s1, 2048 }
   0x3   :  { %s26_s13 = sshll.u32 %s357_s12, 4  ;;  %p264_p0 = scmp.ne.s32.totalorder %s435_s1, %s263_s16  ;;  %s27_s13 = int_to_ptr.vmem [resolvable:$true] %s26_s13 }
   0x4   :  { %p267_p1 = scmp.lt.u32.totalorder %s263_s16, %s435_s1 }
   0x6   :  { %p269_p2 = pnand %p267_p1, %p264_p0 }
   0x8   :  { %272 = shalt.err (!%p269_p2)
}
   0x9   :  { %s273_s21 = scalar_lea.vmem %s27_s13, 2048  ;;  %p278_p4 = scmp.lt.s32.totalorder %s27_s13, %s27_s13 }
   0xa   :  { %p274_p3 = scmp.ne.s32.totalorder %s27_s13, %s273_s21  ;;  %p279_p5 = scmp.lt.s32.totalorder %s273_s21, %s273_s21 }
   0xc   :  { %p280_p6 = por %p279_p5, %p278_p4 }
   0xe   :  { %p281_p7 = pnand %p280_p6, %p274_p3 }
  0x10   :  { %284 = shalt.err (!%p281_p7)
}
  0x11   :  { %s358_s22 = smov 128   ;;  %s359_s23 = smov 8  }
  0x12   :  { %32 = dma.hbm_to_vmem [thread:$0]  %s435_s1, 2048, %s27_s13, [#allocation7], %s358_s22, %s358_s22, %s359_s23  }
  0x13   :  { %s360_s26 = smov [#allocation3]   ;;  %s361_s28 = smov [#allocation8]  }
  0x14   :  { %s17_s27 = sshll.u32 %s360_s26, 4  ;;  %s39_s29 = sshll.u32 %s361_s28, 4  ;;  %s18_s27 = int_to_ptr.vmem [resolvable:$true] %s17_s27  ;;  %s40_s29 = int_to_ptr.vmem [resolvable:$true] %s39_s29 }
  0x15   :  { %s285_s5 = scalar_lea.hbm %s434_s0, 128 }
  0x16   :  { %p286_p8 = scmp.ne.s32.totalorder %s434_s0, %s285_s5  ;;  %p289_p9 = scmp.lt.u32.totalorder %s285_s5, %s434_s0 }
  0x18   :  { %p291_p10 = pnand %p289_p9, %p286_p8 }
  0x1a   :  { %294 = shalt.err (!%p291_p10)
}
  0x1b   :  { %s295_s1 = scalar_lea.vmem %s18_s27, 128  ;;  %p300_p12 = scmp.lt.s32.totalorder %s18_s27, %s18_s27 }
  0x1c   :  { %p296_p11 = scmp.ne.s32.totalorder %s18_s27, %s295_s1  ;;  %p301_p13 = scmp.lt.s32.totalorder %s295_s1, %s295_s1 }
  0x1e   :  { %p302_p0 = por %p301_p13, %p300_p12 }
  0x20   :  { %p303_p1 = pnand %p302_p0, %p296_p11 }
  0x22   :  { %306 = shalt.err (!%p303_p1)
}
  0x23   :  { %20 = dma.hbm_to_vmem [thread:$0]  %s434_s0, 128, %s18_s27, [#allocation4]  }
  0x24   :  { %s307_s14 = scalar_lea.hbm %s436_s2, 16 }
  0x25   :  { %p308_p2 = scmp.ne.s32.totalorder %s436_s2, %s307_s14  ;;  %p311_p3 = scmp.lt.u32.totalorder %s307_s14, %s436_s2 }
  0x27   :  { %p313_p4 = pnand %p311_p3, %p308_p2 }
  0x29   :  { %316 = shalt.err (!%p313_p4)
}
  0x2a   :  { %s317_s19 = scalar_lea.vmem %s40_s29, 16  ;;  %s321_s20 = scalar_lea.vmem %s40_s29, 32 }
  0x2b   :  { %p318_p5 = scmp.ne.s32.totalorder %s40_s29, %s317_s19  ;;  %p322_p6 = scmp.lt.s32.totalorder %s40_s29, %s40_s29 }
  0x2c   :  { %p323_p7 = scmp.lt.s32.totalorder %s321_s20, %s317_s19 }
  0x2e   :  { %p324_p8 = por %p323_p7, %p322_p6 }
  0x30   :  { %p325_p9 = pnand %p324_p8, %p318_p5 }
  0x32   :  { %328 = shalt.err (!%p325_p9)
}
  0x33   :  { %42 = dma.hbm_to_vmem [thread:$0]  %s436_s2, 16, %s40_s29, [#allocation7]  }
  0x34   :  { %351 = dma.done.wait [#allocation4], 128  }
  0x35   :  { %352 = vsyncadd [#allocation4], 4294967168 }
  0x36   :  { %353 = dma.done.wait [#allocation7], 2064  }
  0x37   :  { %354 = vsyncadd [#allocation7], 4294965232  ;;  %v362_v0 = vmov 0.0|0.0   ;;  %vm363_vm0 = vmmov 0   ;;  %v364_v1 = vmov 0.0   ;;  %v59_v2 = vld [vmem:[#allocation6] sm:$0xff] }
  0x38   :  { %230 = vmatprep.subr.bf16.mxu0 %v362_v0  ;;  %227 = vmatprep.mubr.msk.f32.mxu0 %vm363_vm0, %v364_v1  ;;  %v60_v3 = vld [vmem:[#allocation6 + $0x8] sm:$0xff]  ;;  %v61_v5 = vld [vmem:[#allocation6 + $0x10] sm:$0xff]  ;;  %v62_v6 = vld [vmem:[#allocation6 + $0x18] sm:$0xff]  ;;  %s365_s2 = smov [#allocation9]  }
  0x39   :  { %v231_v4 = vpack.c.bf16 %v60_v3, %v59_v2  ;;  %v234_v7 = vpack.c.bf16 %v62_v6, %v61_v5  ;;  %v63_v8 = vld [vmem:[#allocation6 + $0x20] sm:$0xff]  ;;  %v64_v9 = vld [vmem:[#allocation6 + $0x28] sm:$0xff]  ;;  %v65_v11 = vld [vmem:[#allocation6 + $0x30] sm:$0xff]  ;;  %s167_s22 = sshll.u32 %s365_s2, 4  ;;  %s168_s22 = int_to_ptr.vmem [resolvable:$true] %s167_s22 }
  0x3a   :  { %v237_v10 = vpack.c.bf16 %v64_v9, %v63_v8  ;;  %v66_v12 = vld [vmem:[#allocation6 + $0x38] sm:$0xff]  ;;  %v67_v14 = vld [vmem:[#allocation6 + $0x40] sm:$0xff]  ;;  %v68_v15 = vld [vmem:[#allocation6 + $0x48] sm:$0xff]  ;;  %s329_s23 = scalar_lea.vmem %s168_s22, 128  ;;  %p334_p11 = scmp.lt.s32.totalorder %s168_s22, %s168_s22 }
  0x3b   :  { %232 = vmatpush3.bf16.xpose.msra.mxu0 %v231_v4  ;;  %v240_v13 = vpack.c.bf16 %v66_v12, %v65_v11  ;;  %v243_v16 = vpack.c.bf16 %v68_v15, %v67_v14  ;;  %v69_v17 = vld [vmem:[#allocation6 + $0x50] sm:$0xff]  ;;  %v70_v18 = vld [vmem:[#allocation6 + $0x58] sm:$0xff]  ;;  %v71_v20 = vld [vmem:[#allocation6 + $0x60] sm:$0xff]  ;;  %p330_p10 = scmp.ne.s32.totalorder %s168_s22, %s329_s23  ;;  %p335_p12 = scmp.lt.s32.totalorder %s329_s23, %s329_s23 }
  0x3c   :  { %233 = vmatprep.subr.bf16.mxu0 %v362_v0  ;;  %v246_v19 = vpack.c.bf16 %v70_v18, %v69_v17  ;;  %v72_v21 = vld [vmem:[#allocation6 + $0x68] sm:$0xff]  ;;  %v73_v23 = vld [vmem:[#allocation6 + $0x70] sm:$0xff]  ;;  %v74_v24 = vld [vmem:[#allocation6 + $0x78] sm:$0xff] }
  0x3d   :  { %v249_v22 = vpack.c.bf16 %v72_v21, %v71_v20  ;;  %v252_v25 = vpack.c.bf16 %v74_v24, %v73_v23  ;;  %v58_v26 = vld [vmem:[#allocation3] sm:$0xff]  ;;  %v177_v27 = vld [vmem:[#allocation8] ss:$0 sm:$0xff]  ;;  %p336_p13 = por %p335_p12, %p334_p11 }
  0x3f   :  { %p337_p0 = pnand %p336_p13, %p330_p10 }
  0x43   :  { %235 = vmatpush3.bf16.xpose.msra.mxu0 %v234_v7 }
  0x44   :  { %236 = vmatprep.subr.bf16.mxu0 %v362_v0 }
  0x4b   :  { %238 = vmatpush3.bf16.xpose.msra.mxu0 %v237_v10 }
  0x4c   :  { %239 = vmatprep.subr.bf16.mxu0 %v362_v0 }
  0x53   :  { %241 = vmatpush3.bf16.xpose.msra.mxu0 %v240_v13 }
  0x54   :  { %242 = vmatprep.subr.bf16.mxu0 %v362_v0 }
  0x5b   :  { %244 = vmatpush3.bf16.xpose.msra.mxu0 %v243_v16 }
  0x5c   :  { %245 = vmatprep.subr.bf16.mxu0 %v362_v0 }
  0x63   :  { %247 = vmatpush3.bf16.xpose.msra.mxu0 %v246_v19 }
  0x64   :  { %248 = vmatprep.subr.bf16.mxu0 %v362_v0 }
  0x6b   :  { %250 = vmatpush3.bf16.xpose.msra.mxu0 %v249_v22 }
  0x6c   :  { %251 = vmatprep.subr.bf16.mxu0 %v362_v0 }
  0x73   :  { %253 = vmatpush3.bf16.xpose.msra.mxu0 %v252_v25 }
  0x7a   :  { %228 = vmatmul.mubr.f32.vlgmr.msra.gmra.mrb[0].mxu0 %v58_v26 }
 0x14d   :  { %v141_v28 = vpop.f32.mrb[0].mxu0 }
 0x14e   :  { %v158_v29 = vadd.f32 %v177_v27, %v141_v28  ;;  %v229_v30 = vpop.f32.mrb[1].mxu0 }
 0x150   :  { %v159_v31 = vmax.f32 %v158_v29, 0.0 }
 0x152   :  { %160 = vst [vmem:[#allocation9] sm:$0xff] %v159_v31 }
 0x153   :  { %340 = shalt.err (!%p337_p0)
}
 0x154   :  { %s341_s26 = scalar_lea.hbm %s437_s3, 128 }
 0x155   :  { %p342_p1 = scmp.ne.s32.totalorder %s437_s3, %s341_s26  ;;  %p345_p2 = scmp.lt.u32.totalorder %s341_s26, %s437_s3 }
 0x157   :  { %p347_p3 = pnand %p345_p2, %p342_p1 }
 0x159   :  { %350 = shalt.err (!%p347_p3)
}
 0x15a   :  { %170 = dma.vmem_to_hbm [thread:$0]  %s168_s22, 128, %s437_s3, [#allocation5]  }
 0x15b   :  { %355 = dma.done.wait [#allocation5], 128  }
 0x15c   :  { %356 = vsyncadd [#allocation5], 4294967168 }
 0x15d   :  { %174 = vsyncpa [#allocation4], 1 }
 0x15e   :  { %175 = vsyncpa [#allocation7], 1 }
 0x15f   :  { %176 = vsyncpa [#allocation5], 1 }

</bundles_post_ra>
